<compile_context>
chip_gen: v7x
topology: tpu7x:2x2x1
jax: 0.10.0
libtpu: 0.0.40
codegen_flags: <defaults>
</compile_context>

<pallas_src>
import functools

import jax
import jax.numpy as jnp
from jax.experimental import pallas as pl
from jax.experimental.pallas import tpu as pltpu

LANE = 128  # lane width = original rows packed per lane-dense view-row


def _fusion_kernel(x_ref, w_ref, s_ref, o_ref):
    # x_ref: (tg, 128*M)   native dtype, lane-dense packed rows
    # w_ref: (1, 128*M)    f32, weight vector tiled 128x (resident, constant map)
    # s_ref: (128*M, 128)  bf16 0/1 selection matrix (resident, constant map)
    # o_ref: (tg, 128)     lane-dense outputs (original row g*128+j -> lane j)
    xs = (x_ref[...].astype(jnp.float32) * w_ref[...]).astype(jnp.bfloat16)
    o_ref[...] = jnp.dot(
        xs, s_ref[...], preferred_element_type=jnp.float32
    ).astype(o_ref.dtype)


def _run_lane_dense(x2, w_vec, row_block):
    """x2: (R', M) with R' % 128 == 0. Returns (R', 1) weighted sums, x2.dtype."""
    Rp, M = x2.shape
    G = Rp // LANE
    dtype = x2.dtype
    itemsize = jnp.dtype(dtype).itemsize
    sub = max(8, 32 // itemsize)  # sublane granularity: 8 (f32) / 16 (bf16) / 32 (int8)

    # Lane-dense bitcast view (no data movement).
    x2d = x2.reshape(G, LANE * M)

    # Tiled weight for the exact f32 VPU multiply, and the 0/1 bf16 selection
    # matrix for the lane compaction: S[j*M + m, j] = 1.
    w_tiled = jnp.tile(w_vec.astype(jnp.float32), LANE).reshape(1, LANE * M)
    sel = jnp.repeat(jnp.eye(LANE, dtype=jnp.bfloat16), M, axis=0)  # (128*M, 128)

    # Tile selection: as big as row_block allows, but capped so the grid keeps
    # >= MIN_GRID steps whenever a step would still move >= MIN_TG view-rows
    # (~0.5 MiB) — avoids grid collapse (no pipelining, idle v7x TensorCore).
    MIN_GRID, MIN_TG = 4, 256
    tg = min(row_block, G)
    split = pl.cdiv(G, MIN_GRID)
    if split >= MIN_TG:
        tg = min(tg, split)
    if tg < G:
        tg = max(sub, (tg // sub) * sub)
    grid = (pl.cdiv(G, tg),)

    # Scoped-VMEM budget: double-buffered in/out blocks + resident weights.
    in_block = tg * LANE * M * itemsize
    out_block = tg * LANE * itemsize
    resident = w_tiled.size * 4 + sel.size * 2
    needed = 2 * (in_block + out_block) + resident
    vmem_limit = min(max(int(needed * 3 // 2), 16 << 20), 96 << 20)

    cost = pl.CostEstimate(
        flops=int(2 * G * (LANE * M) * LANE),
        transcendentals=0,
        bytes_accessed=int(Rp * M * itemsize + Rp * itemsize + resident),
    )

    out2d = pl.pallas_call(
        _fusion_kernel,
        out_shape=jax.ShapeDtypeStruct((G, LANE), dtype),
        grid_spec=pltpu.PrefetchScalarGridSpec(
            num_scalar_prefetch=0,
            grid=grid,
            in_specs=[
                pl.BlockSpec((tg, LANE * M), lambda i: (i, 0)),    # lane-dense x tile
                pl.BlockSpec((1, LANE * M), lambda i: (0, 0)),     # resident tiled weight
                pl.BlockSpec((LANE * M, LANE), lambda i: (0, 0)),  # resident selection
            ],
            out_specs=pl.BlockSpec((tg, LANE), lambda i: (i, 0)),  # lane-dense output
        ),
        compiler_params=pltpu.CompilerParams(
            dimension_semantics=("parallel",),
            vmem_limit_bytes=vmem_limit,
        ),
        cost_estimate=cost,
    )(x2d, w_tiled, sel)

    return out2d.reshape(Rp, 1)


@functools.partial(jax.jit, static_argnames=("row_block",))
def fusion_uniform_layer(logit_concat, weight, *, row_block=4096):
    """logit_concat: (..., M); weight: (1, M) (PyTorch nn.Linear weight layout)."""
    *lead, M = logit_concat.shape
    R = 1
    for d in lead:
        R *= d
    x2 = logit_concat.reshape(R, M)
    w_vec = weight.reshape(M)

    R_main = (R // LANE) * LANE
    if R_main == 0:
        # Tiny input (< 128 rows): one padded lane-group block (negligible copy).
        xp = jnp.pad(x2, ((0, LANE - R), (0, 0)))
        out = _run_lane_dense(xp, w_vec, row_block)[:R]
    elif R_main == R:
        out = _run_lane_dense(x2, w_vec, row_block)
    else:
        # Main rows through the kernel; the <=127-row tail is a tiny exact jnp
        # reduction (avoids a whole-tensor pad -> extra full HBM read+write).
        out_main = _run_lane_dense(x2[:R_main], w_vec, row_block)
        tail = x2[R_main:].astype(jnp.float32)
        out_tail = jnp.sum(
            tail * w_vec.astype(jnp.float32), axis=-1, keepdims=True
        ).astype(out_main.dtype)
        out = jnp.concatenate([out_main, out_tail], axis=0)
    return out.reshape(*lead, 1)


def init_params(key, num_modalities, dtype=jnp.float32):
    # Matches PyTorch nn.Linear default init: U(-1/sqrt(in), 1/sqrt(in)).
    bound = 1.0 / (num_modalities ** 0.5)
    return jax.random.uniform(
        key, (1, num_modalities), dtype=dtype, minval=-bound, maxval=bound
    )


if __name__ == "__main__":
    key = jax.random.PRNGKey(0)
    k1, k2, k3, k4, kw = jax.random.split(key, 5)

    num_modalities = 4
    weight = init_params(kw, num_modalities)

    def ref(x, w):
        return jnp.sum(
            x.astype(jnp.float32) * w.reshape(-1).astype(jnp.float32),
            axis=-1, keepdims=True,
        )

    # 1) Small module-consistent shape (batch=2, seq=8, M=4): tiny-input path.
    x1 = jax.random.normal(k1, (2, 8, num_modalities), dtype=jnp.float32)
    o1 = jax.block_until_ready(fusion_uniform_layer(x1, weight))
    assert o1.shape == (2, 8, 1), o1.shape
    assert jnp.allclose(o1, ref(x1, weight), atol=1e-2, rtol=1e-2), float(
        jnp.max(jnp.abs(o1 - ref(x1, weight))))

    # 2) Multi-step grid with a ragged last grid block (G=17, tg=8 -> grid=3).
    x2 = jax.random.normal(k2, (17, 128, num_modalities), dtype=jnp.float32)
    o2 = jax.block_until_ready(fusion_uniform_layer(x2, weight, row_block=8))
    assert o2.shape == (17, 128, 1), o2.shape
    assert jnp.allclose(o2, ref(x2, weight), atol=1e-2, rtol=1e-2), float(
        jnp.max(jnp.abs(o2 - ref(x2, weight))))

    # 3) Ragged R (R % 128 != 0): kernel on main rows + jnp tail stitch.
    x3 = jax.random.normal(k3, (5, 77, num_modalities), dtype=jnp.float32)
    o3 = jax.block_until_ready(fusion_uniform_layer(x3, weight))
    assert o3.shape == (5, 77, 1), o3.shape
    assert jnp.allclose(o3, ref(x3, weight), atol=1e-2, rtol=1e-2), float(
        jnp.max(jnp.abs(o3 - ref(x3, weight))))

    # 4) bf16 inputs: native-dtype DMA, 16-sublane tile rounding.
    wb = weight.astype(jnp.bfloat16)
    x4 = jax.random.normal(k4, (40, 128, num_modalities), dtype=jnp.bfloat16)
    o4 = jax.block_until_ready(fusion_uniform_layer(x4, wb, row_block=8))
    assert o4.shape == (40, 128, 1), o4.shape
    assert jnp.allclose(o4.astype(jnp.float32), ref(x4, wb), atol=3e-2, rtol=3e-2), float(
        jnp.max(jnp.abs(o4.astype(jnp.float32) - ref(x4, wb))))

    print("KERNEL_OK")
</pallas_src>

<mosaic_0001>
module attributes {stable_mosaic.version = 11 : i64} {
  func.func @_fusion_kernel(%arg0: i32, %arg1: memref<1x512xf32, #tpu.memory_space<vmem>>, %arg2: memref<1x512xf32, #tpu.memory_space<vmem>>, %arg3: memref<512x128xbf16, #tpu.memory_space<vmem>>, %arg4: memref<1x128xf32, #tpu.memory_space<vmem>>) attributes {dimension_semantics = [#tpu.dimension_semantics<parallel>], iteration_bounds = array<i64: 1>, scalar_prefetch = 0 : i64, scratch_operands = 0 : i64, tpu.core_type = #tpu.core_type<tc>, window_params = [{transform_indices = @transform_0, window_bounds = array<i64: 1, 512>}, {pipeline_mode = #tpu.pipeline_mode<synchronous>, transform_indices = @transform_1, window_bounds = array<i64: 1, 512>}, {pipeline_mode = #tpu.pipeline_mode<synchronous>, transform_indices = @transform_2, window_bounds = array<i64: 512, 128>}, {transform_indices = @transform_3, window_bounds = array<i64: 1, 128>}]} {
    %c0 = arith.constant 0 : index
    %c0_0 = arith.constant 0 : index
    %0 = vector.load %arg1[%c0, %c0_0] : memref<1x512xf32, #tpu.memory_space<vmem>>, vector<1x512xf32>
    %c0_1 = arith.constant 0 : index
    %c0_2 = arith.constant 0 : index
    %1 = vector.load %arg2[%c0_1, %c0_2] : memref<1x512xf32, #tpu.memory_space<vmem>>, vector<1x512xf32>
    %2 = arith.mulf %0, %1 : vector<1x512xf32>
    %3 = arith.truncf %2 : vector<1x512xf32> to vector<1x512xbf16>
    %c0_3 = arith.constant 0 : index
    %c0_4 = arith.constant 0 : index
    %4 = vector.load %arg3[%c0_3, %c0_4] : memref<512x128xbf16, #tpu.memory_space<vmem>>, vector<512x128xbf16>
    %cst = arith.constant dense<0.000000e+00> : vector<1x128xf32>
    %5 = tpu.matmul %3, %4, %cst {dimension_numbers = #tpu.dot_dimension_numbers<[1], [0], [0], [1], [0, 0, 1, 1], [], []>} : vector<1x512xbf16>, vector<512x128xbf16>, vector<1x128xf32> -> vector<1x128xf32>
    %c0_5 = arith.constant 0 : index
    %c0_6 = arith.constant 0 : index
    %6 = vector.load %arg4[%c0_5, %c0_6] : memref<1x128xf32, #tpu.memory_space<vmem>>, vector<1x128xf32>
    tpu.vector_store %arg4[%c0_5, %c0_6], %5 {strides = array<i32>} : memref<1x128xf32, #tpu.memory_space<vmem>>, vector<1x128xf32>,
    return
  }
  func.func @transform_0(%arg0: i32) -> (i32, i32) {
    %c0_i32 = arith.constant 0 : i32
    %c0_i32_0 = arith.constant 0 : i32
    return %arg0, %c0_i32 : i32, i32
  }
  func.func @transform_1(%arg0: i32) -> (i32, i32) {
    %c0_i32 = arith.constant 0 : i32
    %c0_i32_0 = arith.constant 0 : i32
    %c0_i32_1 = arith.constant 0 : i32
    return %c0_i32, %c0_i32_0 : i32, i32
  }
  func.func @transform_2(%arg0: i32) -> (i32, i32) {
    %c0_i32 = arith.constant 0 : i32
    %c0_i32_0 = arith.constant 0 : i32
    %c0_i32_1 = arith.constant 0 : i32
    return %c0_i32, %c0_i32_0 : i32, i32
  }
  func.func @transform_3(%arg0: i32) -> (i32, i32) {
    %c0_i32 = arith.constant 0 : i32
    %c0_i32_0 = arith.constant 0 : i32
    return %arg0, %c0_i32 : i32, i32
  }
}

</mosaic_0001>

<bundles_post_ra>
// kernel: tile.6
= control target key start
LH: loop header
LB: loop body
LE: loop exit
PB: predicated region body
PF: predicated region fallthrough
CT: control target
= control target key end

     0   :  { %s112_s0 = inlined_call_operand.vmem [shape: f32[4], index: 0, kind: input, shape index: {}]   ;;  %s113_s1 = inlined_call_operand.vmem [shape: f32[128,4], index: 1, kind: output, shape index: {}]  }
   0x1   :  { %v4_v0 = vld [vmem:[%s112_s0] ss:$0 sm:$0xff] }
   0x2   :  { %5 = vst [vmem:[%s113_s1] sm:$0xff] %v4_v0  ;;  %36 = vst [vmem:[%s113_s1 + $0x8] sm:$0xff] %v4_v0 }
   0x3   :  { %37 = vst [vmem:[%s113_s1 + $0x10] sm:$0xff] %v4_v0  ;;  %38 = vst [vmem:[%s113_s1 + $0x18] sm:$0xff] %v4_v0 }
   0x4   :  { %39 = vst [vmem:[%s113_s1 + $0x20] sm:$0xff] %v4_v0  ;;  %40 = vst [vmem:[%s113_s1 + $0x28] sm:$0xff] %v4_v0 }
   0x5   :  { %41 = vst [vmem:[%s113_s1 + $0x30] sm:$0xff] %v4_v0  ;;  %42 = vst [vmem:[%s113_s1 + $0x38] sm:$0xff] %v4_v0 }
   0x6   :  { %43 = vst [vmem:[%s113_s1 + $0x40] sm:$0xff] %v4_v0  ;;  %44 = vst [vmem:[%s113_s1 + $0x48] sm:$0xff] %v4_v0 }
   0x7   :  { %45 = vst [vmem:[%s113_s1 + $0x50] sm:$0xff] %v4_v0  ;;  %46 = vst [vmem:[%s113_s1 + $0x58] sm:$0xff] %v4_v0 }
   0x8   :  { %47 = vst [vmem:[%s113_s1 + $0x60] sm:$0xff] %v4_v0  ;;  %48 = vst [vmem:[%s113_s1 + $0x68] sm:$0xff] %v4_v0 }
   0x9   :  { %49 = vst [vmem:[%s113_s1 + $0x70] sm:$0xff] %v4_v0  ;;  %50 = vst [vmem:[%s113_s1 + $0x78] sm:$0xff] %v4_v0 }

</bundles_post_ra>
